<compile_context>
chip_gen: v5e
topology: v5e:2x2
jax: 0.10.0
libtpu: 0.0.40
codegen_flags: <defaults>
</compile_context>

<pallas_src>
import jax
import jax.numpy as jnp
from jax.experimental import pallas as pl
from jax.experimental.pallas import tpu as pltpu


def _round_up(n, m):
    return (n + m - 1) // m * m


def _fused_mlp_softmax_kernel(x_ref, doc_ref,
                              w1x_ref, w1e_eff_ref, b1_ref,
                              w2_ref, b2_ref, w3_ref, b3_ref,
                              o_ref):
    """One batch tile: fused (embedding->fc1) + fc2 + fc3 + softmax."""
    tm = x_ref.shape[0]
    num_doctors = w1e_eff_ref.shape[0]

    # ---- Embedding lookup folded into fc1: one-hot @ (emb_table @ W1e).
    ids = doc_ref[...]                                                 # (TM, 1) int32
    iota = jax.lax.broadcasted_iota(jnp.int32, (tm, num_doctors), 1)   # (TM, ND)
    onehot = jnp.where(iota == ids, 1.0, 0.0).astype(jnp.bfloat16)     # (TM, ND)

    # ---- fc1: x @ W1x + onehot @ w1e_eff + b1, relu
    x_bf = x_ref[...].astype(jnp.bfloat16)
    h = (jnp.dot(x_bf, w1x_ref[...], preferred_element_type=jnp.float32)
         + jnp.dot(onehot, w1e_eff_ref[...], preferred_element_type=jnp.float32)
         + b1_ref[...])
    h = jnp.maximum(h, 0.0)

    # ---- fc2 + relu
    h = jnp.dot(h.astype(jnp.bfloat16), w2_ref[...],
                preferred_element_type=jnp.float32) + b2_ref[...]
    h = jnp.maximum(h, 0.0)

    # ---- fc3
    logits = jnp.dot(h.astype(jnp.bfloat16), w3_ref[...],
                     preferred_element_type=jnp.float32) + b3_ref[...]

    # ---- softmax over feature axis (f32, exact divide for torch.softmax parity)
    m = jnp.max(logits, axis=1, keepdims=True)
    e = jnp.exp(logits - m)
    s = jnp.sum(e, axis=1, keepdims=True)
    o_ref[...] = (e / s).astype(o_ref.dtype)


def hospitalization_forward(params, x, doctor_id, *, tile_rows=2048):
    """x: (B, num_features) f32, doctor_id: (B,) int -> (B, output_size) f32."""
    B, num_features = x.shape
    emb_table = params["embedding"]
    num_doctors, embedding_dim = emb_table.shape
    hidden = params["w1"].shape[1]
    out_size = params["w3"].shape[1]

    # Split fc1's weight along its input axis and fold the embedding in (f32, once).
    w1x = params["w1"][:num_features]                 # (num_features, hidden)
    w1e = params["w1"][num_features:]                 # (embedding_dim, hidden)
    w1e_eff = emb_table @ w1e                         # (num_doctors, hidden), f32 fold

    # Pre-cast the tiny, VMEM-resident weights to bf16 for the MXU.
    w1x_bf = w1x.astype(jnp.bfloat16)
    w1e_eff_bf = w1e_eff.astype(jnp.bfloat16)
    w2_bf = params["w2"].astype(jnp.bfloat16)
    w3_bf = params["w3"].astype(jnp.bfloat16)

    # ---- Batch tile selection: multiple of 8, capped at tile_rows, and split so the
    #      grid has >= 2 steps whenever B > 8 (v7x megacore; negligible elsewhere).
    tm = min(tile_rows, _round_up(B, 8))
    if B > 8 and pl.cdiv(B, tm) < 2:
        tm = _round_up(pl.cdiv(B, 2), 8)
    grid = (pl.cdiv(B, tm),)                          # ragged last block, no jnp.pad

    doc2d = doctor_id.astype(jnp.int32).reshape(B, 1)

    row_spec = lambda cols: pl.BlockSpec((tm, cols), lambda i: (i, 0))
    rep_spec = lambda arr: pl.BlockSpec(arr.shape, lambda i: (0, 0))

    flops = 2 * B * (num_doctors * hidden + num_features * hidden
                     + hidden * hidden + hidden * out_size)
    bytes_accessed = (B * num_features * 4 + B * 4 + B * out_size * 4
                      + 2 * (num_doctors * hidden + num_features * hidden
                             + hidden * hidden + hidden * out_size)
                      + 4 * (2 * hidden + out_size))

    out = pl.pallas_call(
        _fused_mlp_softmax_kernel,
        out_shape=jax.ShapeDtypeStruct((B, out_size), jnp.float32),
        grid=grid,
        in_specs=[
            row_spec(num_features),        # x tile
            row_spec(1),                   # doctor_id tile
            rep_spec(w1x_bf),              # fc1 weight (x part), resident
            rep_spec(w1e_eff_bf),          # folded embedding @ fc1 weight, resident
            rep_spec(params["b1"]),
            rep_spec(w2_bf), rep_spec(params["b2"]),
            rep_spec(w3_bf), rep_spec(params["b3"]),
        ],
        out_specs=row_spec(out_size),
        compiler_params=pltpu.CompilerParams(
            dimension_semantics=("parallel",),
            vmem_limit_bytes=32 * 1024 * 1024),
        cost_estimate=pl.CostEstimate(
            flops=flops,
            transcendentals=B * out_size,
            bytes_accessed=bytes_accessed),
    )(x, doc2d, w1x_bf, w1e_eff_bf, params["b1"],
      w2_bf, params["b2"], w3_bf, params["b3"])

    return out


def init_params(key, num_doctors, embedding_dim, input_size, hidden_size,
                output_size):
    ks = jax.random.split(key, 7)
    scale = 0.1
    return {
        "embedding": scale * jax.random.normal(
            ks[0], (num_doctors, embedding_dim), jnp.float32),
        "w1": scale * jax.random.normal(ks[1], (input_size, hidden_size), jnp.float32),
        "b1": scale * jax.random.normal(ks[2], (1, hidden_size), jnp.float32),
        "w2": scale * jax.random.normal(ks[3], (hidden_size, hidden_size), jnp.float32),
        "b2": scale * jax.random.normal(ks[4], (1, hidden_size), jnp.float32),
        "w3": scale * jax.random.normal(ks[5], (hidden_size, output_size), jnp.float32),
        "b3": scale * jax.random.normal(ks[6], (1, output_size), jnp.float32),
    }


def reference_forward(params, x, doctor_id):
    """Pure-JAX f32 reference matching the PyTorch forward."""
    emb = params["embedding"][doctor_id]
    xc = jnp.concatenate([x, emb], axis=1)
    h = jnp.maximum(xc @ params["w1"] + params["b1"], 0.0)
    h = jnp.maximum(h @ params["w2"] + params["b2"], 0.0)
    logits = h @ params["w3"] + params["b3"]
    return jax.nn.softmax(logits, axis=1)


if __name__ == "__main__":
    # Small shapes consistent with the module:
    #   num_features + embedding_dim == input_size (fc1 input)
    batch = 10                      # not a multiple of 8 -> ragged last block + 2 grid steps
    num_features = 24
    embedding_dim = 8
    input_size = num_features + embedding_dim   # 32
    hidden_size = 32
    output_size = 4
    num_doctors = 16

    key = jax.random.PRNGKey(0)
    k_x, k_doc, k_p = jax.random.split(key, 3)

    params = init_params(k_p, num_doctors, embedding_dim, input_size,
                         hidden_size, output_size)
    x = jax.random.normal(k_x, (batch, num_features), jnp.float32)
    doctor_id = jax.random.randint(k_doc, (batch,), 0, num_doctors, jnp.int32)

    fwd = jax.jit(hospitalization_forward)
    out = jax.block_until_ready(fwd(params, x, doctor_id))

    # Sanity: shape, rows sum to 1 (exact divide), and close to the f32 reference
    # (bf16 MXU matmuls, f32 accumulation/epilogue).
    assert out.shape == (batch, output_size)
    assert jnp.allclose(jnp.sum(out, axis=1), 1.0, atol=1e-4)
    ref = reference_forward(params, x, doctor_id)
    assert jnp.allclose(out, ref, atol=5e-2), float(jnp.max(jnp.abs(out - ref)))

    print("KERNEL_OK")
</pallas_src>

<mosaic_0001>
module attributes {stable_mosaic.version = 11 : i64} {
  func.func @_fused_mlp_softmax_kernel(%arg0: i32, %arg1: memref<8x24xf32, #tpu.memory_space<vmem>>, %arg2: memref<8x1xi32, #tpu.memory_space<vmem>>, %arg3: memref<24x32xbf16, #tpu.memory_space<vmem>>, %arg4: memref<16x32xbf16, #tpu.memory_space<vmem>>, %arg5: memref<1x32xf32, #tpu.memory_space<vmem>>, %arg6: memref<32x32xbf16, #tpu.memory_space<vmem>>, %arg7: memref<1x32xf32, #tpu.memory_space<vmem>>, %arg8: memref<32x4xbf16, #tpu.memory_space<vmem>>, %arg9: memref<1x4xf32, #tpu.memory_space<vmem>>, %arg10: memref<8x4xf32, #tpu.memory_space<vmem>>) attributes {dimension_semantics = [#tpu.dimension_semantics<parallel>], iteration_bounds = array<i64: 2>, scalar_prefetch = 0 : i64, scratch_operands = 0 : i64, tpu.core_type = #tpu.core_type<tc>, window_params = [{transform_indices = @transform_0, window_bounds = array<i64: 8, 24>}, {transform_indices = @transform_1, window_bounds = array<i64: 8, 1>}, {pipeline_mode = #tpu.pipeline_mode<synchronous>, transform_indices = @transform_2, window_bounds = array<i64: 24, 32>}, {pipeline_mode = #tpu.pipeline_mode<synchronous>, transform_indices = @transform_3, window_bounds = array<i64: 16, 32>}, {pipeline_mode = #tpu.pipeline_mode<synchronous>, transform_indices = @transform_4, window_bounds = array<i64: 1, 32>}, {pipeline_mode = #tpu.pipeline_mode<synchronous>, transform_indices = @transform_5, window_bounds = array<i64: 32, 32>}, {pipeline_mode = #tpu.pipeline_mode<synchronous>, transform_indices = @transform_6, window_bounds = array<i64: 1, 32>}, {pipeline_mode = #tpu.pipeline_mode<synchronous>, transform_indices = @transform_7, window_bounds = array<i64: 32, 4>}, {pipeline_mode = #tpu.pipeline_mode<synchronous>, transform_indices = @transform_8, window_bounds = array<i64: 1, 4>}, {transform_indices = @transform_9, window_bounds = array<i64: 8, 4>}]} {
    %c0 = arith.constant 0 : index
    %c0_0 = arith.constant 0 : index
    %0 = vector.load %arg2[%c0, %c0_0] : memref<8x1xi32, #tpu.memory_space<vmem>>, vector<8x1xi32>
    %1 = tpu.iota {dimensions = array<i32: 1>} : vector<8x16xi32>
    %2 = vector.broadcast %0 : vector<8x1xi32> to vector<8x16xi32>
    %3 = arith.cmpi eq, %1, %2 : vector<8x16xi32>
    %cst = arith.constant 1.000000e+00 : f32
    %cst_1 = arith.constant 0.000000e+00 : f32
    %4 = vector.broadcast %cst : f32 to vector<8x16xf32>
    %5 = vector.broadcast %cst_1 : f32 to vector<8x16xf32>
    %6 = arith.select %3, %4, %5 : vector<8x16xi1>, vector<8x16xf32>
    %7 = arith.truncf %6 : vector<8x16xf32> to vector<8x16xbf16>
    %c0_2 = arith.constant 0 : index
    %c0_3 = arith.constant 0 : index
    %8 = vector.load %arg1[%c0_2, %c0_3] : memref<8x24xf32, #tpu.memory_space<vmem>>, vector<8x24xf32>
    %9 = arith.truncf %8 : vector<8x24xf32> to vector<8x24xbf16>
    %c0_4 = arith.constant 0 : index
    %c0_5 = arith.constant 0 : index
    %10 = vector.load %arg3[%c0_4, %c0_5] : memref<24x32xbf16, #tpu.memory_space<vmem>>, vector<24x32xbf16>
    %cst_6 = arith.constant dense<0.000000e+00> : vector<8x32xf32>
    %11 = tpu.matmul %9, %10, %cst_6 {dimension_numbers = #tpu.dot_dimension_numbers<[1], [0], [0], [1], [0, 0, 1, 1], [], []>} : vector<8x24xbf16>, vector<24x32xbf16>, vector<8x32xf32> -> vector<8x32xf32>
    %c0_7 = arith.constant 0 : index
    %c0_8 = arith.constant 0 : index
    %12 = vector.load %arg4[%c0_7, %c0_8] : memref<16x32xbf16, #tpu.memory_space<vmem>>, vector<16x32xbf16>
    %cst_9 = arith.constant dense<0.000000e+00> : vector<8x32xf32>
    %13 = tpu.matmul %7, %12, %cst_9 {dimension_numbers = #tpu.dot_dimension_numbers<[1], [0], [0], [1], [0, 0, 1, 1], [], []>} : vector<8x16xbf16>, vector<16x32xbf16>, vector<8x32xf32> -> vector<8x32xf32>
    %14 = arith.addf %11, %13 : vector<8x32xf32>
    %c0_10 = arith.constant 0 : index
    %c0_11 = arith.constant 0 : index
    %15 = vector.load %arg5[%c0_10, %c0_11] : memref<1x32xf32, #tpu.memory_space<vmem>>, vector<1x32xf32>
    %16 = vector.broadcast %15 : vector<1x32xf32> to vector<8x32xf32>
    %17 = arith.addf %14, %16 : vector<8x32xf32>
    %cst_12 = arith.constant 0.000000e+00 : f32
    %18 = vector.broadcast %cst_12 : f32 to vector<8x32xf32>
    %19 = arith.maximumf %17, %18 : vector<8x32xf32>
    %20 = arith.truncf %19 : vector<8x32xf32> to vector<8x32xbf16>
    %c0_13 = arith.constant 0 : index
    %c0_14 = arith.constant 0 : index
    %21 = vector.load %arg6[%c0_13, %c0_14] : memref<32x32xbf16, #tpu.memory_space<vmem>>, vector<32x32xbf16>
    %cst_15 = arith.constant dense<0.000000e+00> : vector<8x32xf32>
    %22 = tpu.matmul %20, %21, %cst_15 {dimension_numbers = #tpu.dot_dimension_numbers<[1], [0], [0], [1], [0, 0, 1, 1], [], []>} : vector<8x32xbf16>, vector<32x32xbf16>, vector<8x32xf32> -> vector<8x32xf32>
    %c0_16 = arith.constant 0 : index
    %c0_17 = arith.constant 0 : index
    %23 = vector.load %arg7[%c0_16, %c0_17] : memref<1x32xf32, #tpu.memory_space<vmem>>, vector<1x32xf32>
    %24 = vector.broadcast %23 : vector<1x32xf32> to vector<8x32xf32>
    %25 = arith.addf %22, %24 : vector<8x32xf32>
    %cst_18 = arith.constant 0.000000e+00 : f32
    %26 = vector.broadcast %cst_18 : f32 to vector<8x32xf32>
    %27 = arith.maximumf %25, %26 : vector<8x32xf32>
    %28 = arith.truncf %27 : vector<8x32xf32> to vector<8x32xbf16>
    %c0_19 = arith.constant 0 : index
    %c0_20 = arith.constant 0 : index
    %29 = vector.load %arg8[%c0_19, %c0_20] : memref<32x4xbf16, #tpu.memory_space<vmem>>, vector<32x4xbf16>
    %cst_21 = arith.constant dense<0.000000e+00> : vector<8x4xf32>
    %30 = tpu.matmul %28, %29, %cst_21 {dimension_numbers = #tpu.dot_dimension_numbers<[1], [0], [0], [1], [0, 0, 1, 1], [], []>} : vector<8x32xbf16>, vector<32x4xbf16>, vector<8x4xf32> -> vector<8x4xf32>
    %c0_22 = arith.constant 0 : index
    %c0_23 = arith.constant 0 : index
    %31 = vector.load %arg9[%c0_22, %c0_23] : memref<1x4xf32, #tpu.memory_space<vmem>>, vector<1x4xf32>
    %32 = vector.broadcast %31 : vector<1x4xf32> to vector<8x4xf32>
    %33 = arith.addf %30, %32 : vector<8x4xf32>
    %cst_24 = arith.constant dense<0xFF800000> : vector<8xf32>
    %34 = vector.multi_reduction <maximumf>, %33, %cst_24 [1] : vector<8x4xf32> to vector<8xf32>
    %35 = vector.shape_cast %34 : vector<8xf32> to vector<8x1xf32>
    %36 = vector.broadcast %35 : vector<8x1xf32> to vector<8x4xf32>
    %37 = arith.subf %33, %36 : vector<8x4xf32>
    %38 = math.exp %37 : vector<8x4xf32>
    %cst_25 = arith.constant dense<0.000000e+00> : vector<8xf32>
    %39 = vector.multi_reduction <add>, %38, %cst_25 [1] : vector<8x4xf32> to vector<8xf32>
    %40 = vector.shape_cast %39 : vector<8xf32> to vector<8x1xf32>
    %41 = vector.broadcast %40 : vector<8x1xf32> to vector<8x4xf32>
    %42 = arith.divf %38, %41 : vector<8x4xf32>
    %c0_26 = arith.constant 0 : index
    %c0_27 = arith.constant 0 : index
    %43 = vector.load %arg10[%c0_26, %c0_27] : memref<8x4xf32, #tpu.memory_space<vmem>>, vector<8x4xf32>
    tpu.vector_store %arg10[%c0_26, %c0_27], %42 {strides = array<i32>} : memref<8x4xf32, #tpu.memory_space<vmem>>, vector<8x4xf32>,
    return
  }
  func.func @transform_0(%arg0: i32) -> (i32, i32) {
    %c0_i32 = arith.constant 0 : i32
    %c0_i32_0 = arith.constant 0 : i32
    return %arg0, %c0_i32 : i32, i32
  }
  func.func @transform_1(%arg0: i32) -> (i32, i32) {
    %c0_i32 = arith.constant 0 : i32
    %c0_i32_0 = arith.constant 0 : i32
    return %arg0, %c0_i32 : i32, i32
  }
  func.func @transform_2(%arg0: i32) -> (i32, i32) {
    %c0_i32 = arith.constant 0 : i32
    %c0_i32_0 = arith.constant 0 : i32
    %c0_i32_1 = arith.constant 0 : i32
    return %c0_i32, %c0_i32_0 : i32, i32
  }
  func.func @transform_3(%arg0: i32) -> (i32, i32) {
    %c0_i32 = arith.constant 0 : i32
    %c0_i32_0 = arith.constant 0 : i32
    %c0_i32_1 = arith.constant 0 : i32
    return %c0_i32, %c0_i32_0 : i32, i32
  }
  func.func @transform_4(%arg0: i32) -> (i32, i32) {
    %c0_i32 = arith.constant 0 : i32
    %c0_i32_0 = arith.constant 0 : i32
    %c0_i32_1 = arith.constant 0 : i32
    return %c0_i32, %c0_i32_0 : i32, i32
  }
  func.func @transform_5(%arg0: i32) -> (i32, i32) {
    %c0_i32 = arith.constant 0 : i32
    %c0_i32_0 = arith.constant 0 : i32
    %c0_i32_1 = arith.constant 0 : i32
    return %c0_i32, %c0_i32_0 : i32, i32
  }
  func.func @transform_6(%arg0: i32) -> (i32, i32) {
    %c0_i32 = arith.constant 0 : i32
    %c0_i32_0 = arith.constant 0 : i32
    %c0_i32_1 = arith.constant 0 : i32
    return %c0_i32, %c0_i32_0 : i32, i32
  }
  func.func @transform_7(%arg0: i32) -> (i32, i32) {
    %c0_i32 = arith.constant 0 : i32
    %c0_i32_0 = arith.constant 0 : i32
    %c0_i32_1 = arith.constant 0 : i32
    return %c0_i32, %c0_i32_0 : i32, i32
  }
  func.func @transform_8(%arg0: i32) -> (i32, i32) {
    %c0_i32 = arith.constant 0 : i32
    %c0_i32_0 = arith.constant 0 : i32
    %c0_i32_1 = arith.constant 0 : i32
    return %c0_i32, %c0_i32_0 : i32, i32
  }
  func.func @transform_9(%arg0: i32) -> (i32, i32) {
    %c0_i32 = arith.constant 0 : i32
    %c0_i32_0 = arith.constant 0 : i32
    return %arg0, %c0_i32 : i32, i32
  }
}

</mosaic_0001>

<bundles_post_ra>
// kernel: hospitalization_forward.1
= control target key start
LH: loop header
LB: loop body
LE: loop exit
PB: predicated region body
PF: predicated region fallthrough
CT: control target
= control target key end

     0   :  { %s710_s30 = smov 0   ;;  %s768_s0 = inlined_call_operand.vmem [shape: f32[10,24], index: 0, kind: input, shape index: {}]   ;;  %s769_s1 = inlined_call_operand.vmem [shape: s32[10,1], index: 1, kind: input, shape index: {}]   ;;  %s770_s2 = inlined_call_operand.vmem [shape: bf16[24,32], index: 2, kind: input, shape index: {}]   ;;  %s771_s3 = inlined_call_operand.vmem [shape: bf16[16,32], index: 3, kind: input, shape index: {}]   ;;  %s772_s4 = inlined_call_operand.vmem [shape: f32[1,32], index: 4, kind: input, shape index: {}]   ;;  %s773_s5 = inlined_call_operand.vmem [shape: bf16[32,32], index: 5, kind: input, shape index: {}]   ;;  %s774_s6 = inlined_call_operand.vmem [shape: f32[1,32], index: 6, kind: input, shape index: {}]   ;;  %s775_s7 = inlined_call_operand.vmem [shape: bf16[32,4], index: 7, kind: input, shape index: {}]   ;;  %s776_s8 = inlined_call_operand.vmem [shape: f32[1,4], index: 8, kind: input, shape index: {}]   ;;  %s777_s9 = inlined_call_operand.vmem [shape: f32[10,4], index: 9, kind: output, shape index: {}]  }
   0x1 LB: > { %s588_s10 = sadd.s32 4294967295, %s656_s30   ;;  %p592_p0 = scmp.ge.s32.totalorder %s656_s30, 1  ;;  %s656_s30 = sphi %s710_s30, %s19_s30  }
   0x2   : > { %p295_p1 = scmp.lt.s32.totalorder %s656_s30, 3 }
   0x4   : > { %p296_p2 = pnand %p592_p0, %p295_p1 }
   0x5   : > { %p333_p3 = scmp.lt.s32.totalorder (!%p296_p2), %s588_s10, 1 }
   0x6   : > { %299 = sbr.rel (%p296_p2) target bundleno = 805 (0x325), region = 56 }
   0xb   : > { %v359_v0 = vld [vmem:[%s770_s2 + $0x8] sm:$0xf]  ;;  %v658_v1 = vmov 0   ;;  %s779_s10 = smov (!%p333_p3, %s588_s10), 1  ;;  %vm398_vm0 = vcmask 1043456   ;;  %v626_v6 = vld [vmem:[%s770_s2] sm:$0xff]  ;;  %v347_v10 = vlaneseq }
   0xc   : > { %642 = vset.pattern.permute.xlu0 %v658_v1  ;;  %v390_v2 = vunpack.c.l.b16 %v359_v0  ;;  %s721_s13 = sshll.u32 %s779_s10, 3  ;;  %vm394_vm1 = vcmask 195584   ;;  %v627_v9 = vld [vmem:[%s771_s3] sm:$0xff]  ;;  %v659_v13 = vmov 0.0   ;;  %vm368_vm3 = vcmask 130048   ;;  %v629_v18 = vld [vmem:[%s773_s5 + $0x8] sm:$0xff] }
   0xd   : > { %s340_s16 = scalar_lea.vmem %s769_s1, %s721_s13  ;;  %s336_s21 = scalar_lea.vmem %s768_s0, %s721_s13  ;;  %379 = vmatpush.bf16.msra.mxu0 %v627_v9  ;;  %v348_v11 = vand.u32 127, %v347_v10  ;;  %452 = vmatpush.bf16.msra.mxu2 %v629_v18  ;;  %v628_v19 = vld [vmem:[%s773_s5] sm:$0xff]  ;;  %vm442_vm4 = vcmask 261120   ;;  %v631_v27 = vld [vmem:[%s775_s7 + $0x8] sm:$0xff]  ;;  %vm497_vm5 = vcmask 31744  }
   0xe   : > { %v392_v3 = vpack.c.b16 %v390_v2, %v390_v2  ;;  %v346_v5 = vld [vmem:[%s340_s16] sm:$0xff]  ;;  %490 = vmatpush.bf16.msra.mxu3 %v631_v27 }
   0xf   : > { %350 = vperm.xlu0 %642, %v346_v5   ;;  %v355_v7 = vld [vmem:[%s336_s21] sm:$0xff]  ;;  %s344_s21 = scalar_lea.vmem %s777_s9, %s721_s13 }
  0x10   : > { %v400_v4 = vsel %vm398_vm0, %v392_v3, 0  ;;  %v356_v8 = vpack.c.bf16 %v355_v7, %v355_v7  ;;  %v643_v20 = vld [vmem:[%s772_s4] ss:$0 sm:$0xff] }
  0x11   : > { %408 = vmatpush.bf16.msra.mxu1 %v400_v4  ;;  %453 = vmatpush.bf16.msra.mxu2 %v628_v19  ;;  %v630_v28 = vld [vmem:[%s775_s7] sm:$0xff] }
  0x12   : > { %491 = vmatpush.bf16.msra.mxu3 %v630_v28  ;;  %v644_v29 = vld [vmem:[%s774_s6] ss:$0 sm:$0xff] }
  0x13   : > { %v645_v35 = vld [vmem:[%s776_s8] ss:$0 sm:$0xff] }
  0x15   : > { %409 = vmatpush.bf16.msra.mxu1 %v626_v6 }
  0x18   : > { %605 = vmatmul.msk.bf16.vlgmr.msra.gmra.mxu1 %vm394_vm1, %v356_v8 }
  0x81   : > { %v351_v12 = vpop.permute.xlu0 %350 }
  0x82   : > { %vm352_vm2 = vcmp.eq.s32.totalorder %v348_v11, %v351_v12 }
  0x83   : > { %v353_v14 = vsel %vm352_vm2, 1.0, %v659_v13 }
  0x84   : > { %v354_v15 = vpack.c.bf16 %v353_v14, %v353_v14 }
  0x86   : > { %600 = vmatmul.msk.bf16.vlgmr.msra.gmra.mxu0 %vm368_vm3, %v354_v15 }
  0x95   : > { %v411_v16 = vpop.f32.mrf.mxu1 }
  0x9d   : > { %v413_v17 = vpop.f32.mrf.mxu1 }
 0x103   : > { %v381_v21 = vpop.f32.mrf.mxu0 }
 0x104   : > { %v412_v22 = vadd.f32 %v411_v16, %v381_v21 }
 0x106   : > { %v419_v23 = vadd.f32 %v643_v20, %v412_v22 }
 0x108   : > { %v420_v24 = vmax.f32 %v419_v23, 0.0 }
 0x10a   : > { %v421_v25 = vpack.c.bf16 %v420_v24, %v420_v24 }
 0x10b   : > { %v383_v26 = vpop.f32.mrf.mxu0 }
 0x10c   : > { %614 = vmatmul.msk.bf16.vlgmr.msra.gmra.mxu2 %vm442_vm4, %v421_v25 }
 0x18f   : > { %v455_v30 = vpop.f32.mrf.mxu2 }
 0x190   : > { %v456_v31 = vadd.f32 %v644_v29, %v455_v30 }
 0x192   : > { %v459_v32 = vmax.f32 %v456_v31, 0.0 }
 0x194   : > { %v460_v33 = vpack.c.bf16 %v459_v32, %v459_v32 }
 0x196   : > { %623 = vmatmul.msk.bf16.vlgmr.msra.gmra.mxu3 %vm442_vm4, %v460_v33 }
 0x197   : > { %v457_v34 = vpop.f32.mrf.mxu2 }
 0x219   : > { %v493_v36 = vpop.f32.mrf.mxu3 }
 0x21a   : > { %v494_v37 = vadd.f32 %v645_v35, %v493_v36 }
 0x21c   : > { %v498_v38 = vsel %vm497_vm5, %v494_v37, -inf }
 0x21d   : > { %499 = vmax.xlane.f32.xlu0 %v498_v38 }
 0x221   : > { %v495_v39 = vpop.f32.mrf.mxu3 }
 0x290   : > { %v500_v40 = vpop.xlane.xlu0 %499 }
 0x291   : > { %v501_v41 = vsub.f32 %v494_v37, %v500_v40 }
 0x293   : > { %v502_v42 = vmul.f32 1.442695, %v501_v41 }
 0x295   : > { %646 = vpow2.f32 %v502_v42 }
 0x29b   : > { %v647_v43 = vpop.eup %646 }
 0x29c   : > { %v504_v44 = vsel %vm497_vm5, %v647_v43, 0.0 }
 0x29d   : > { %505 = vadd.xlane.f32.xlu1 %v504_v44 }
 0x310   : > { %v506_v45 = vpop.xlane.xlu1 %505 }
 0x311   : > { %648 = vrcp.f32 %v506_v45  ;;  %v518_v49 = vand.u32 2147483648, %v506_v45  ;;  %v516_v51 = vand.u32 2147483647, %v506_v45  ;;  %vm512_vm7 = vweird.f32 %v506_v45 }
 0x313   : > { %v519_v53 = vor.u32 1.1754944e-38, %v518_v49  ;;  %vm517_vm9 = vcmp.eq.f32.partialorder %v516_v51, 8.507059e+37 }
 0x317   : > { %v649_v46 = vpop.eup %648 }
 0x318   : > { %v508_v47 = vmul.f32 %v649_v46, %v506_v45  ;;  %vm513_vm6 = vweird.f32 %v649_v46 }
 0x319   : > { %vm514_vm8 = vmor %vm512_vm7, %vm513_vm6 }
 0x31a   : > { %v509_v48 = vsub.f32 1.0, %v508_v47 }
 0x31c   : > { %v510_v50 = vmul.f32 %v649_v46, %v509_v48 }
 0x31e   : > { %v511_v52 = vadd.f32 %v649_v46, %v510_v50 }
 0x320   : > { %v515_v54 = vsel %vm514_vm8, %v649_v46, %v511_v52 }
 0x321   : > { %v520_v55 = vsel %vm517_vm9, %v519_v53, %v515_v54 }
 0x322   : > { %v521_v56 = vmul.f32 %v647_v43, %v520_v55 }
 0x324   : > { %522 = vst.msk [vmem:[%s344_s21] sm:$0xff] %vm497_vm5, %v521_v56 }
 0x325 PF: > { %s19_s30 = sadd.s32 1, %s656_s30  }
 0x326   : > { %p16_p4 = scmp.ge.s32.totalorder %s19_s30, 4  }
 0x328   :  { %18 = sbr.rel (!%p16_p4) target bundleno = 1 (0x1), region = 89 }

</bundles_post_ra>
